<compile_context>
chip_gen: v5e
topology: v5e:2x2
jax: 0.10.0
libtpu: 0.0.40
codegen_flags: <defaults>
</compile_context>

<pallas_src>
import functools

import jax
import jax.numpy as jnp
from jax.experimental import pallas as pl
from jax.experimental.pallas import tpu as pltpu


def _ce_kernel(logits_ref, targets_ref, avail_ref, out_ref, *, n_valid):
    """Masked cross-entropy over one (row_tile, D_out) slab.

    logits_ref : (TN, D)   float32 VMEM tile (rows on sublanes, classes on lanes)
    targets_ref: (TN, 1)   int32   (column-shaped on purpose: it broadcasts
                                    natively against the (TN, D) class axis, so
                                    no lane<->sublane relayout is needed)
    avail_ref  : (TN, 1)   int32
    out_ref    : (1, 1, 1) float32 per-tile partial sum (distinct block per
                 grid step -> no cross-step dependence -> "parallel" grid axis)
    """
    i = pl.program_id(0)

    x = logits_ref[...].astype(jnp.float32)                  # (TN, D)
    tn, d = x.shape

    # Single iota reused for both the availability mask and the target gather.
    col = jax.lax.broadcasted_iota(jnp.int32, (tn, d), 1)

    avail = avail_ref[...]                                   # (TN, 1)
    tgt = targets_ref[...]                                   # (TN, 1)

    # masked_fill(indices >= available_k, -inf)
    xm = jnp.where(col >= avail, jnp.float32(-jnp.inf), x)   # (TN, D)

    # Stable log-sum-exp over classes: exactly one exp per element and one log
    # per row (keeps the single-EUP v5e in the memory-bound regime).
    m = jnp.max(xm, axis=-1, keepdims=True)                  # (TN, 1)
    sumexp = jnp.sum(jnp.exp(xm - m), axis=-1, keepdims=True)
    lse = m + jnp.log(sumexp)                                # (TN, 1)

    # Target logit via one-hot select on the *masked* logits (a target that is
    # itself masked yields -inf -> +inf loss, matching the PyTorch module).
    tgt_logit = jnp.sum(jnp.where(col == tgt, xm, 0.0), axis=-1, keepdims=True)

    per_row = lse - tgt_logit                                # (TN, 1)

    # Zero out rows that only exist because of padding (global row >= true N).
    row = jax.lax.broadcasted_iota(jnp.int32, (tn, 1), 0) + i * tn
    per_row = jnp.where(row < n_valid, per_row, 0.0)

    out_ref[...] = jnp.sum(per_row).reshape(1, 1, 1)


def _pick_row_tile(n, d_out, *, tile_budget_bytes=16 * 1024 * 1024, max_rows=1024):
    """Largest 8-aligned row tile whose double-buffered f32 logits slab fits the budget."""
    rows = tile_budget_bytes // max(1, 2 * d_out * 4)   # 2 pipeline buffers, f32
    rows = int(min(rows, max_rows))
    rows = max(8, (rows // 8) * 8)
    n_rounded = max(8, ((n + 7) // 8) * 8)
    return min(rows, n_rounded)


def custom_cross_entropy_loss(logits, targets, available_k, *, row_tile=None,
                              vmem_limit_bytes=32 * 1024 * 1024):
    """Pallas-backed equivalent of CustomCrossEntropyLoss_draft0.forward."""
    bsz, L2, D_out = logits.shape
    N = bsz * L2

    if row_tile is None:
        row_tile = _pick_row_tile(N, D_out)
    assert row_tile % 8 == 0, "row_tile must be a multiple of 8"

    N_pad = ((N + row_tile - 1) // row_tile) * row_tile
    num_tiles = N_pad // row_tile

    logits_flat = logits.reshape(N, D_out).astype(jnp.float32)
    targets_col = targets.reshape(N, 1).astype(jnp.int32)
    avail_col = available_k.reshape(N, 1).astype(jnp.int32)

    if N_pad != N:
        pad = N_pad - N
        # Padded rows: zero logits, all classes "available", target 0 -> finite
        # loss that the kernel masks to 0 via the static true row count.
        logits_flat = jnp.pad(logits_flat, ((0, pad), (0, 0)))
        targets_col = jnp.pad(targets_col, ((0, pad), (0, 0)))
        avail_col = jnp.pad(avail_col, ((0, pad), (0, 0)), constant_values=D_out)

    kernel = functools.partial(_ce_kernel, n_valid=N)

    partial_sums = pl.pallas_call(
        kernel,
        out_shape=jax.ShapeDtypeStruct((num_tiles, 1, 1), jnp.float32),
        grid_spec=pltpu.PrefetchScalarGridSpec(
            num_scalar_prefetch=0,
            grid=(num_tiles,),
            in_specs=[
                pl.BlockSpec((row_tile, D_out), lambda i: (i, 0)),
                pl.BlockSpec((row_tile, 1), lambda i: (i, 0)),
                pl.BlockSpec((row_tile, 1), lambda i: (i, 0)),
            ],
            # One (1,1,1) block per grid step: independent outputs, so the row
            # axis can be sharded across TensorCores on v7x.
            out_specs=pl.BlockSpec((1, 1, 1), lambda i: (i, 0, 0)),
        ),
        compiler_params=pltpu.CompilerParams(
            dimension_semantics=("parallel",),
            vmem_limit_bytes=vmem_limit_bytes,
        ),
    )(logits_flat, targets_col, avail_col)

    # reduction='mean' over all N (true) rows — final tiny reduce in the wrapper.
    return jnp.sum(partial_sums) / jnp.float32(N)


def _reference_loss(logits, targets, available_k):
    """Pure-JAX reference matching the PyTorch module."""
    bsz, L2, D_out = logits.shape
    idx = jnp.arange(D_out).reshape(1, 1, D_out)
    mask = idx >= available_k[..., None]
    xm = jnp.where(mask, -jnp.inf, logits.astype(jnp.float32))
    lse = jax.scipy.special.logsumexp(xm, axis=-1)
    tgt_logit = jnp.take_along_axis(xm, targets[..., None], axis=-1)[..., 0]
    return jnp.mean(lse - tgt_logit)


def _make_inputs(key, bsz, L2, D_out):
    k1, k2, k3 = jax.random.split(key, 3)
    logits = jax.random.normal(k1, (bsz, L2, D_out), dtype=jnp.float32)
    # available_k in [1, D_out]
    available_k = jax.random.randint(k2, (bsz, L2), 1, D_out + 1, dtype=jnp.int32)
    # targets strictly within the valid range so the loss is finite
    targets = jax.random.randint(k3, (bsz, L2), 0, D_out, dtype=jnp.int32)
    targets = jnp.minimum(targets, available_k - 1)
    return logits, targets, available_k


if __name__ == "__main__":
    key = jax.random.PRNGKey(0)
    k_a, k_b = jax.random.split(key)

    # Case 1: spec-sized input, auto row tile (single tile).
    logits, targets, available_k = _make_inputs(k_a, bsz=2, L2=8, D_out=32)
    loss = jax.block_until_ready(custom_cross_entropy_loss(logits, targets, available_k))
    ref = _reference_loss(logits, targets, available_k)
    assert jnp.allclose(loss, ref, rtol=1e-5, atol=1e-5), (loss, ref)

    # Case 2: N not divisible by the row tile -> exercises padding + multi-tile
    # "parallel" grid with per-tile partial sums.
    logits2, targets2, available_k2 = _make_inputs(k_b, bsz=3, L2=5, D_out=32)
    loss2 = jax.block_until_ready(
        custom_cross_entropy_loss(logits2, targets2, available_k2, row_tile=8))
    ref2 = _reference_loss(logits2, targets2, available_k2)
    assert jnp.allclose(loss2, ref2, rtol=1e-5, atol=1e-5), (loss2, ref2)

    print("KERNEL_OK")
</pallas_src>

<mosaic_0001>
module attributes {stable_mosaic.version = 11 : i64} {
  func.func @_ce_kernel(%arg0: i32, %arg1: memref<16x32xf32, #tpu.memory_space<vmem>>, %arg2: memref<16x1xi32, #tpu.memory_space<vmem>>, %arg3: memref<16x1xi32, #tpu.memory_space<vmem>>, %arg4: memref<1x1x1xf32, #tpu.memory_space<vmem>>) attributes {dimension_semantics = [#tpu.dimension_semantics<parallel>], iteration_bounds = array<i64: 1>, scalar_prefetch = 0 : i64, scratch_operands = 0 : i64, tpu.core_type = #tpu.core_type<tc>, window_params = [{transform_indices = @transform_0, window_bounds = array<i64: 16, 32>}, {transform_indices = @transform_1, window_bounds = array<i64: 16, 1>}, {transform_indices = @transform_2, window_bounds = array<i64: 16, 1>}, {transform_indices = @transform_3, window_bounds = array<i64: 1, 1, 1>}]} {
    %c0 = arith.constant 0 : index
    %c0_0 = arith.constant 0 : index
    %0 = vector.load %arg1[%c0, %c0_0] : memref<16x32xf32, #tpu.memory_space<vmem>>, vector<16x32xf32>
    %1 = tpu.iota {dimensions = array<i32: 1>} : vector<16x32xi32>
    %c0_1 = arith.constant 0 : index
    %c0_2 = arith.constant 0 : index
    %2 = vector.load %arg3[%c0_1, %c0_2] : memref<16x1xi32, #tpu.memory_space<vmem>>, vector<16x1xi32>
    %c0_3 = arith.constant 0 : index
    %c0_4 = arith.constant 0 : index
    %3 = vector.load %arg2[%c0_3, %c0_4] : memref<16x1xi32, #tpu.memory_space<vmem>>, vector<16x1xi32>
    %4 = vector.broadcast %2 : vector<16x1xi32> to vector<16x32xi32>
    %5 = arith.cmpi sge, %1, %4 : vector<16x32xi32>
    %cst = arith.constant 0xFF800000 : f32
    %6 = vector.broadcast %cst : f32 to vector<16x32xf32>
    %7 = arith.select %5, %6, %0 : vector<16x32xi1>, vector<16x32xf32>
    %cst_5 = arith.constant dense<0xFF800000> : vector<16xf32>
    %8 = vector.multi_reduction <maximumf>, %7, %cst_5 [1] : vector<16x32xf32> to vector<16xf32>
    %9 = vector.shape_cast %8 : vector<16xf32> to vector<16x1xf32>
    %10 = vector.broadcast %9 : vector<16x1xf32> to vector<16x32xf32>
    %11 = arith.subf %7, %10 : vector<16x32xf32>
    %12 = math.exp %11 : vector<16x32xf32>
    %cst_6 = arith.constant dense<0.000000e+00> : vector<16xf32>
    %13 = vector.multi_reduction <add>, %12, %cst_6 [1] : vector<16x32xf32> to vector<16xf32>
    %14 = vector.shape_cast %13 : vector<16xf32> to vector<16x1xf32>
    %15 = math.log %14 : vector<16x1xf32>
    %16 = arith.addf %9, %15 : vector<16x1xf32>
    %17 = vector.broadcast %3 : vector<16x1xi32> to vector<16x32xi32>
    %18 = arith.cmpi eq, %1, %17 : vector<16x32xi32>
    %cst_7 = arith.constant 0.000000e+00 : f32
    %19 = vector.broadcast %cst_7 : f32 to vector<16x32xf32>
    %20 = arith.select %18, %7, %19 : vector<16x32xi1>, vector<16x32xf32>
    %cst_8 = arith.constant dense<0.000000e+00> : vector<16xf32>
    %21 = vector.multi_reduction <add>, %20, %cst_8 [1] : vector<16x32xf32> to vector<16xf32>
    %22 = vector.shape_cast %21 : vector<16xf32> to vector<16x1xf32>
    %23 = arith.subf %16, %22 : vector<16x1xf32>
    %24 = tpu.iota {dimensions = array<i32: 0>} : vector<16x1xi32>
    %c16_i32 = arith.constant 16 : i32
    %25 = arith.muli %arg0, %c16_i32 : i32
    %26 = vector.broadcast %25 : i32 to vector<16x1xi32>
    %27 = arith.addi %24, %26 : vector<16x1xi32>
    %c16_i32_9 = arith.constant 16 : i32
    %28 = vector.broadcast %c16_i32_9 : i32 to vector<16x1xi32>
    %29 = arith.cmpi slt, %27, %28 : vector<16x1xi32>
    %cst_10 = arith.constant 0.000000e+00 : f32
    %30 = vector.broadcast %cst_10 : f32 to vector<16x1xf32>
    %31 = arith.select %29, %23, %30 : vector<16x1xi1>, vector<16x1xf32>
    %32 = vector.shape_cast %31 : vector<16x1xf32> to vector<1x16x1xf32>
    %cst_11 = arith.constant dense<0.000000e+00> : vector<1xf32>
    %33 = vector.multi_reduction <add>, %32, %cst_11 [1, 2] : vector<1x16x1xf32> to vector<1xf32>
    %34 = vector.shape_cast %33 : vector<1xf32> to vector<1x1x1xf32>
    %35 = vector.extract %34[0, 0, 0] : f32 from vector<1x1x1xf32>
    %36 = vector.broadcast %35 : f32 to vector<1x1x1xf32>
    %c0_12 = arith.constant 0 : index
    %c0_13 = arith.constant 0 : index
    %c0_14 = arith.constant 0 : index
    %37 = vector.load %arg4[%c0_12, %c0_13, %c0_14] : memref<1x1x1xf32, #tpu.memory_space<vmem>>, vector<1x1x1xf32>
    tpu.vector_store %arg4[%c0_12, %c0_13, %c0_14], %36 {strides = array<i32>} : memref<1x1x1xf32, #tpu.memory_space<vmem>>, vector<1x1x1xf32>,
    return
  }
  func.func @transform_0(%arg0: i32) -> (i32, i32) {
    %c0_i32 = arith.constant 0 : i32
    %c0_i32_0 = arith.constant 0 : i32
    return %arg0, %c0_i32 : i32, i32
  }
  func.func @transform_1(%arg0: i32) -> (i32, i32) {
    %c0_i32 = arith.constant 0 : i32
    %c0_i32_0 = arith.constant 0 : i32
    return %arg0, %c0_i32 : i32, i32
  }
  func.func @transform_2(%arg0: i32) -> (i32, i32) {
    %c0_i32 = arith.constant 0 : i32
    %c0_i32_0 = arith.constant 0 : i32
    return %arg0, %c0_i32 : i32, i32
  }
  func.func @transform_3(%arg0: i32) -> (i32, i32, i32) {
    %c0_i32 = arith.constant 0 : i32
    %c0_i32_0 = arith.constant 0 : i32
    %c0_i32_1 = arith.constant 0 : i32
    return %arg0, %c0_i32, %c0_i32_0 : i32, i32, i32
  }
}

</mosaic_0001>

<bundles_post_ra>
// kernel: tpu_custom_call.1
= control target key start
LH: loop header
LB: loop body
LE: loop exit
PB: predicated region body
PF: predicated region fallthrough
CT: control target
= control target key end

     0   :  { %v159_v2 = vmov 0   ;;  %s208_s0 = inlined_call_operand.vmem [shape: f32[16,32], index: 0, kind: input, shape index: {}]   ;;  %s209_s1 = inlined_call_operand.vmem [shape: s32[16,1], index: 1, kind: input, shape index: {}]   ;;  %s210_s2 = inlined_call_operand.vmem [shape: s32[16,1], index: 2, kind: input, shape index: {}]   ;;  %s211_s3 = inlined_call_operand.hbm [shape: f32[1,1,1], index: 3, kind: output, shape index: {}]  }
   0x1   :  { %v19_v0 = vld [vmem:[%s210_s2] sm:$0xff]  ;;  %123 = vset.pattern.permute.xlu0 %v159_v2  ;;  %124 = vset.pattern.permute.xlu2 %v159_v2 }
   0x2   :  { %v21_v1 = vld [vmem:[%s209_s1] sm:$0xff] }
   0x3   :  { %8 = vsyncpa [#allocation3], 0  ;;  %24 = vperm.xlu0 %123, %v19_v0   ;;  %59 = vperm.xlu2 %124, %v21_v1   ;;  %v20_v3 = vld [vmem:[%s210_s2 + $0x8] sm:$0xff]  ;;  %v17_v5 = vlaneseq  ;;  %v15_v8 = vld [vmem:[%s208_s0] sm:$0xff]  ;;  %vm33_vm1 = vcmask 261120   ;;  %vm87_vm5 = vcmask 7168  }
   0x4   :  { %v22_v4 = vld [vmem:[%s209_s1 + $0x8] sm:$0xff]  ;;  %s110_s25 = sshll.u32 %s211_s3, 4  ;;  %vm101_vm6 = vcmask 0   ;;  %s111_s25 = int_to_ptr.hbm [resolvable:$true] %s110_s25 }
   0x5   :  { %v18_v6 = vand.u32 127, %v17_v5  ;;  %v16_v14 = vld [vmem:[%s208_s0 + $0x8] sm:$0xff]  ;;  %s160_s0 = smov [#allocation2]  }
   0x6   :  { %s108_s22 = sshll.u32 %s160_s0, 4  ;;  %s109_s22 = int_to_ptr.vmem [resolvable:$true] %s108_s22 }
   0xb   :  { %27 = vperm.xlu0 %123, %v20_v3   ;;  %62 = vperm.xlu2 %124, %v22_v4  }
  0x5d   :  { %v60_v7 = vpop.permute.xlu2 %59 }
  0x5e   :  { %vm64_vm0 = vcmp.eq.s32.totalorder %v18_v6, %v60_v7 }
  0x65   :  { %v63_v27 = vpop.permute.xlu2 %62 }
  0x66   :  { %vm65_vm4 = vcmp.eq.s32.totalorder %v18_v6, %v63_v27 }
  0x75   :  { %v25_v9 = vpop.permute.xlu0 %24 }
  0x76   :  { %vm29_vm2 = vcmp.ge.s32.totalorder %v18_v6, %v25_v9 }
  0x77   :  { %v31_v10 = vsel %vm29_vm2, -inf, %v15_v8 }
  0x78   :  { %v34_v11 = vsel %vm33_vm1, %v31_v10, -inf  ;;  %v66_v12 = vsel %vm64_vm0, %v31_v10, 0.0 }
  0x79   :  { %35 = vmax.xlane.f32.xlu1 %v34_v11  ;;  %v68_v13 = vsel %vm33_vm1, %v66_v12, 0.0 }
  0x7a   :  { %69 = vadd.xlane.f32.xlu2 %v68_v13 }
  0x7d   :  { %v28_v15 = vpop.permute.xlu0 %27 }
  0x7e   :  { %vm30_vm3 = vcmp.ge.s32.totalorder %v18_v6, %v28_v15 }
  0x7f   :  { %v32_v16 = vsel %vm30_vm3, -inf, %v16_v14 }
  0x80   :  { %v37_v17 = vsel %vm33_vm1, %v32_v16, -inf  ;;  %v67_v29 = vsel %vm65_vm4, %v32_v16, 0.0 }
  0x81   :  { %38 = vmax.xlane.f32.xlu1 %v37_v17  ;;  %v71_v30 = vsel %vm33_vm1, %v67_v29, 0.0 }
  0xec   :  { %v36_v18 = vpop.xlane.xlu1 %35 }
  0xed   :  { %v40_v19 = vsub.f32 %v31_v10, %v36_v18  ;;  %v70_v38 = vpop.xlane.xlu2 %69 }
  0xef   :  { %v42_v20 = vmul.f32 1.442695, %v40_v19 }
  0xf1   :  { %125 = vpow2.f32 %v42_v20 }
  0xf4   :  { %v39_v21 = vpop.xlane.xlu1 %38 }
  0xf5   :  { %v41_v22 = vsub.f32 %v32_v16, %v39_v21 }
  0xf7   :  { %v126_v23 = vpop.eup %125  ;;  %v44_v24 = vmul.f32 1.442695, %v41_v22 }
  0xf8   :  { %v46_v25 = vsel %vm33_vm1, %v126_v23, 0.0 }
  0xf9   :  { %127 = vpow2.f32 %v44_v24  ;;  %47 = vadd.xlane.f32.xlu0 %v46_v25 }
  0xff   :  { %v128_v26 = vpop.eup %127 }
 0x100   :  { %v49_v28 = vsel %vm33_vm1, %v128_v26, 0.0 }
 0x101   :  { %50 = vadd.xlane.f32.xlu1 %v49_v28 }
 0x109   :  { %72 = vadd.xlane.f32.xlu1 %v71_v30 }
 0x16c   :  { %v48_v31 = vpop.xlane.xlu0 %47 }
 0x16d   :  { %129 = vlog2.f32 %v48_v31 }
 0x173   :  { %v130_v32 = vpop.eup %129 }
 0x174   :  { %v51_v33 = vpop.xlane.xlu1 %50  ;;  %v53_v34 = vmul.f32 0.6931472, %v130_v32 }
 0x175   :  { %131 = vlog2.f32 %v51_v33 }
 0x176   :  { %v56_v35 = vadd.f32 %v53_v34, %v36_v18 }
 0x178   :  { %v74_v40 = vsub.f32 %v56_v35, %v70_v38 }
 0x17a   :  { %v88_v43 = vsel %vm87_vm5, %v74_v40, 0.0 }
 0x17b   :  { %v132_v36 = vpop.eup %131 }
 0x17c   :  { %v55_v37 = vmul.f32 0.6931472, %v132_v36  ;;  %v73_v41 = vpop.xlane.xlu1 %72 }
 0x17e   :  { %v57_v39 = vadd.f32 %v55_v37, %v39_v21 }
 0x180   :  { %v75_v42 = vsub.f32 %v57_v39, %v73_v41 }
 0x182   :  { %v89_v44 = vsel %vm87_vm5, %v75_v42, 0.0 }
 0x183   :  { %v90_v45 = vadd.f32 %v89_v44, %v88_v43 }
 0x185   :  { %91 = vadd.xlane.f32.xlu1 %v90_v45 }
 0x1f8   :  { %v92_v46 = vpop.xlane.xlu1 %91 }
 0x1f9   :  { %v93_v47 = vrot.slane %v92_v46, 4 }
 0x1fb   :  { %v94_v48 = vadd.f32 %v93_v47, %v92_v46 }
 0x1fd   :  { %v95_v49 = vrot.slane %v94_v48, 2 }
 0x1ff   :  { %v96_v50 = vadd.f32 %v95_v49, %v94_v48 }
 0x201   :  { %v97_v51 = vrot.slane %v96_v50, 1 }
 0x203   :  { %v98_v52 = vadd.f32 %v97_v51, %v96_v50 }
 0x205   :  { %119 = vpush %v98_v52 }
 0x236   :  { %s120_s26 = spop %119 }
 0x237   :  { %v100_v53 = vstv %s120_s26 }
 0x238   :  { %102 = vst.msk [vmem:[#allocation2] sm:$0x1] %vm101_vm6, %v100_v53 }
 0x239   :  { %113 = dma.vmem_to_hbm [thread:$0]  %s109_s22, 16, %s111_s25, [#allocation3]  }
 0x23a   :  { %157 = dma.done.wait [#allocation3], 16  }
 0x23b   :  { %158 = vsyncadd [#allocation3], 4294967280 }
 0x23c   :  { %118 = vsyncpa [#allocation3], 1 }

</bundles_post_ra>
